<compile_context>
chip_gen: v7x
topology: tpu7x:2x2x1
jax: 0.10.0
libtpu: 0.0.40
codegen_flags: <defaults>
</compile_context>

<pallas_src>
import jax
import jax.numpy as jnp
from jax import lax
from jax.experimental import pallas as pl
from jax.experimental.pallas import tpu as pltpu


# --------------------------------------------------------------------------
# Kernels
# --------------------------------------------------------------------------
def _ca_fused_kernel(beta_ref, x_ref, o_ref):
    """Fast path: one batch element per grid step, whole (C, HW) slab in VMEM."""
    x = x_ref[...]                                            # (C, HW), input dtype

    # energy[c, d] = sum_n x[c, n] * x[d, n]  (RHS consumed transposed inside
    # the MXU -- no materialized x.T), f32 accumulation.
    energy = lax.dot_general(
        x, x, dimension_numbers=(((1,), (1,)), ((), ())),
        preferred_element_type=jnp.float32)                   # (C, C) f32

    # softmax(rowmax(E) - E) == exp(rowmin(E) - E) / sum(...): one XLU reduce,
    # exponents <= 0 so numerically safe.  Exact divide for parity with torch.
    row_min = jnp.min(energy, axis=-1, keepdims=True)
    p = jnp.exp(row_min - energy)
    denom = jnp.sum(p, axis=-1, keepdims=True)                # (C, 1), >= 1
    beta = beta_ref[...]                                      # (1, 1) f32
    attn = p * (beta / denom)                                 # beta folded into attn

    # out = (beta * attn) @ x ; residual added in f32.
    out = jnp.dot(attn.astype(x.dtype), x,
                  preferred_element_type=jnp.float32)         # (C, HW) f32
    o_ref[...] = (out + x.astype(jnp.float32)).astype(o_ref.dtype)


def _ca_attn_kernel(beta_ref, x_ref, attn_ref):
    """Tiled path, phase 1: accumulate the gram over HW tiles directly into the
    resident attention output block; softmax (+beta) in place at the last tile."""
    k = pl.program_id(1)

    @pl.when(k == 0)
    def _():
        attn_ref[...] = jnp.zeros_like(attn_ref)

    xt = x_ref[...]                                           # (C, thw)
    attn_ref[...] += lax.dot_general(
        xt, xt, dimension_numbers=(((1,), (1,)), ((), ())),
        preferred_element_type=jnp.float32)

    @pl.when(k == pl.num_programs(1) - 1)
    def _():
        energy = attn_ref[...]                                # (C, C) f32
        row_min = jnp.min(energy, axis=-1, keepdims=True)
        p = jnp.exp(row_min - energy)
        denom = jnp.sum(p, axis=-1, keepdims=True)
        beta = beta_ref[...]                                  # (1, 1) f32
        attn_ref[...] = p * (beta / denom)                    # beta folded once here


def _ca_apply_kernel(attn_ref, x_ref, o_ref):
    """Tiled path, phase 2: out_tile = attn @ x_tile + x_tile (beta already folded)."""
    xt = x_ref[...]                                           # (C, thw)
    attn = attn_ref[...]                                      # (C, C) f32
    out = jnp.dot(attn.astype(xt.dtype), xt,
                  preferred_element_type=jnp.float32)
    o_ref[...] = (out + xt.astype(jnp.float32)).astype(o_ref.dtype)


# --------------------------------------------------------------------------
# Sizing policy
# --------------------------------------------------------------------------
def _round_up(x, m):
    return ((x + m - 1) // m) * m


def _vmem_policy():
    """Per-generation (budget, scoped-limit) in bytes derived from physical VMEM."""
    cap = None
    try:
        cap = getattr(pltpu.get_tpu_info(), "vmem_capacity_bytes", None)
    except Exception:
        cap = None
    if not cap:
        cap = 64 * 1024 * 1024        # conservative fallback (v7x-sized)
    vmem_limit = (3 * cap) // 4       # ~96 MiB on 128-MiB parts, 48 MiB on v7x
    budget = cap // 2                 # ~64 MiB on v5e/v6e, 32 MiB on v7x
    return budget, vmem_limit


def _single_pass_bytes(C, HW, in_bytes):
    Cp, HWp = _round_up(C, 8), _round_up(HW, 128)
    io = 4 * Cp * HWp * in_bytes          # double-buffered x-in + out blocks
    tmp = 2 * Cp * HWp * 4                # f32 attn@x result + f32 residual copy
    cc = 4 * Cp * _round_up(C, 128) * 4   # energy / p / attn / reductions
    return io + tmp + cc


def _tiled_bytes(C, thw, in_bytes):
    Cp = _round_up(C, 8)
    io = 4 * Cp * thw * in_bytes
    tmp = 2 * Cp * thw * 4
    cc = 6 * Cp * _round_up(C, 128) * 4   # resident attn block + temporaries
    return io + tmp + cc


def _pick_thw(HWp, C, in_bytes, budget, target):
    """Largest multiple of 128 that divides HWp, fits budget, and <= target."""
    target = max(128, (int(target) // 128) * 128)
    thw = max(128, (min(HWp, target) // 128) * 128)
    while thw > 128 and _tiled_bytes(C, thw, in_bytes) > budget:
        thw -= 128
    while HWp % thw != 0:                 # terminates: 128 always divides HWp
        thw -= 128
    return thw


# --------------------------------------------------------------------------
# pallas_call wrappers
# --------------------------------------------------------------------------
def _run_single_pass(x_flat, beta2, vmem_limit):
    B, C, HW = x_flat.shape
    return pl.pallas_call(
        _ca_fused_kernel,
        out_shape=jax.ShapeDtypeStruct((B, C, HW), x_flat.dtype),
        grid_spec=pltpu.PrefetchScalarGridSpec(
            num_scalar_prefetch=0,
            grid=(B,),
            in_specs=[
                pl.BlockSpec((1, 1), lambda b: (0, 0)),              # beta
                pl.BlockSpec((None, C, HW), lambda b: (b, 0, 0)),    # x (batch squeezed)
            ],
            out_specs=pl.BlockSpec((None, C, HW), lambda b: (b, 0, 0)),
        ),
        compiler_params=pltpu.CompilerParams(
            dimension_semantics=("parallel",),
            vmem_limit_bytes=vmem_limit),
    )(beta2, x_flat)


def _run_tiled(x_flat, beta2, hw_tile, budget, vmem_limit):
    B, C, HW = x_flat.shape
    in_bytes = x_flat.dtype.itemsize

    # Pad only to a lane multiple of 128 (zeros change neither the gram nor
    # attn @ x); no pad at all in the common HW % 128 == 0 case.
    HWp = _round_up(HW, 128)
    xp = x_flat if HWp == HW else jnp.pad(
        x_flat, ((0, 0), (0, 0), (0, HWp - HW)))

    thw = _pick_thw(HWp, C, in_bytes, budget, hw_tile)
    n_hw = HWp // thw

    # Phase 1: gram accumulated into the resident attention block + softmax.
    attn = pl.pallas_call(
        _ca_attn_kernel,
        out_shape=jax.ShapeDtypeStruct((B, C, C), jnp.float32),
        grid_spec=pltpu.PrefetchScalarGridSpec(
            num_scalar_prefetch=0,
            grid=(B, n_hw),
            in_specs=[
                pl.BlockSpec((1, 1), lambda b, k: (0, 0)),            # beta
                pl.BlockSpec((None, C, thw), lambda b, k: (b, 0, k)),  # x tile
            ],
            out_specs=pl.BlockSpec((None, C, C), lambda b, k: (b, 0, 0)),
        ),
        compiler_params=pltpu.CompilerParams(
            dimension_semantics=("parallel", "arbitrary"),
            vmem_limit_bytes=vmem_limit),
    )(beta2, xp)

    # Phase 2: attn @ x_tile + x_tile; both grid axes parallel.
    out = pl.pallas_call(
        _ca_apply_kernel,
        out_shape=jax.ShapeDtypeStruct((B, C, HWp), x_flat.dtype),
        grid_spec=pltpu.PrefetchScalarGridSpec(
            num_scalar_prefetch=0,
            grid=(B, n_hw),
            in_specs=[
                pl.BlockSpec((None, C, C), lambda b, k: (b, 0, 0)),    # attn
                pl.BlockSpec((None, C, thw), lambda b, k: (b, 0, k)),  # x tile
            ],
            out_specs=pl.BlockSpec((None, C, thw), lambda b, k: (b, 0, k)),
        ),
        compiler_params=pltpu.CompilerParams(
            dimension_semantics=("parallel", "parallel"),
            vmem_limit_bytes=vmem_limit),
    )(attn, xp)

    return out if HWp == HW else out[:, :, :HW]


def ca_module_forward(x_nchw, beta, *, hw_tile=2048, force_tiled=False):
    """x_nchw: (B, C, H, W); beta: float32 array of shape (1,) (PyTorch init: 0)."""
    B, C, H, W = x_nchw.shape
    HW = H * W
    in_bytes = x_nchw.dtype.itemsize
    x_flat = x_nchw.reshape(B, C, HW)
    beta2 = jnp.asarray(beta, jnp.float32).reshape(1, 1)

    budget, vmem_limit = _vmem_policy()

    use_fused = (not force_tiled
                 and B >= 2                       # keep >= 2 grid steps
                 and _single_pass_bytes(C, HW, in_bytes) <= budget)
    if use_fused:
        out = _run_single_pass(x_flat, beta2, vmem_limit)
    else:
        out = _run_tiled(x_flat, beta2, hw_tile, budget, vmem_limit)
    return out.reshape(B, C, H, W)


# --------------------------------------------------------------------------
# Pure-JAX reference
# --------------------------------------------------------------------------
def _reference(x, beta):
    B, C, H, W = x.shape
    xf = x.reshape(B, C, H * W).astype(jnp.float32)
    energy = jnp.einsum("bcn,bdn->bcd", xf, xf,
                        precision=lax.Precision.HIGHEST)
    energy_new = jnp.max(energy, axis=-1, keepdims=True) - energy
    attention = jax.nn.softmax(energy_new, axis=-1)
    out = jnp.einsum("bcd,bdn->bcn", attention, xf,
                     precision=lax.Precision.HIGHEST).reshape(B, C, H, W)
    return (beta[0] * out + x.astype(jnp.float32)).astype(x.dtype)


if __name__ == "__main__":
    key = jax.random.PRNGKey(0)
    B, C, H, W = 2, 4, 16, 16
    x = jax.random.normal(key, (B, C, H, W), dtype=jnp.float32)

    # PyTorch init is beta = zeros(1); use a nonzero value so the attention
    # path actually contributes (set to 0.0 to match a fresh init).
    beta = jnp.array([0.5], dtype=jnp.float32)

    y_ref = _reference(x, beta)

    # Fused single-pass path (default for shapes that fit VMEM and B >= 2).
    y = jax.block_until_ready(ca_module_forward(x, beta))
    assert jnp.allclose(y, y_ref, atol=2e-3, rtol=2e-3), "fused path mismatch"

    # HW-tiled two-phase path (used for B == 1 or large C*HW).
    y_tiled = jax.block_until_ready(
        ca_module_forward(x, beta, force_tiled=True, hw_tile=128))
    assert jnp.allclose(y_tiled, y_ref, atol=2e-3, rtol=2e-3), "tiled path mismatch"

    print("KERNEL_OK")
</pallas_src>

<mosaic_0001>
module attributes {stable_mosaic.version = 11 : i64} {
  func.func @_ca_fused_kernel(%arg0: i32, %arg1: memref<1x1xf32, #tpu.memory_space<vmem>>, %arg2: memref<1x4x256xf32, #tpu.memory_space<vmem>>, %arg3: memref<1x4x256xf32, #tpu.memory_space<vmem>>) attributes {dimension_semantics = [#tpu.dimension_semantics<parallel>], iteration_bounds = array<i64: 2>, scalar_prefetch = 0 : i64, scratch_operands = 0 : i64, tpu.core_type = #tpu.core_type<tc>, window_params = [{pipeline_mode = #tpu.pipeline_mode<synchronous>, transform_indices = @transform_0, window_bounds = array<i64: 1, 1>}, {transform_indices = @transform_1, window_bounds = array<i64: 1, 4, 256>}, {transform_indices = @transform_2, window_bounds = array<i64: 1, 4, 256>}]} {
    %c0 = arith.constant 0 : index
    %c0_0 = arith.constant 0 : index
    %c0_1 = arith.constant 0 : index
    %0 = vector.load %arg2[%c0, %c0_0, %c0_1] : memref<1x4x256xf32, #tpu.memory_space<vmem>>, vector<1x4x256xf32>
    %1 = vector.shape_cast %0 : vector<1x4x256xf32> to vector<4x256xf32>
    %cst = arith.constant dense<0.000000e+00> : vector<4x4xf32>
    %2 = tpu.matmul %1, %1, %cst {dimension_numbers = #tpu.dot_dimension_numbers<[1], [1], [0], [0], [0, 0, 1, 0], [], []>} : vector<4x256xf32>, vector<4x256xf32>, vector<4x4xf32> -> vector<4x4xf32>
    %cst_2 = arith.constant dense<0x7F800000> : vector<4xf32>
    %3 = vector.multi_reduction <minimumf>, %2, %cst_2 [1] : vector<4x4xf32> to vector<4xf32>
    %4 = vector.shape_cast %3 : vector<4xf32> to vector<4x1xf32>
    %5 = vector.broadcast %4 : vector<4x1xf32> to vector<4x4xf32>
    %6 = arith.subf %5, %2 : vector<4x4xf32>
    %7 = math.exp %6 : vector<4x4xf32>
    %cst_3 = arith.constant dense<0.000000e+00> : vector<4xf32>
    %8 = vector.multi_reduction <add>, %7, %cst_3 [1] : vector<4x4xf32> to vector<4xf32>
    %9 = vector.shape_cast %8 : vector<4xf32> to vector<4x1xf32>
    %c0_4 = arith.constant 0 : index
    %c0_5 = arith.constant 0 : index
    %10 = vector.load %arg1[%c0_4, %c0_5] : memref<1x1xf32, #tpu.memory_space<vmem>>, vector<1x1xf32>
    %11 = vector.broadcast %10 : vector<1x1xf32> to vector<4x1xf32>
    %12 = arith.divf %11, %9 : vector<4x1xf32>
    %13 = vector.broadcast %12 : vector<4x1xf32> to vector<4x4xf32>
    %14 = arith.mulf %7, %13 : vector<4x4xf32>
    %cst_6 = arith.constant dense<0.000000e+00> : vector<4x256xf32>
    %15 = tpu.matmul %14, %1, %cst_6 {dimension_numbers = #tpu.dot_dimension_numbers<[1], [0], [0], [1], [0, 0, 1, 1], [], []>} : vector<4x4xf32>, vector<4x256xf32>, vector<4x256xf32> -> vector<4x256xf32>
    %16 = arith.addf %15, %1 : vector<4x256xf32>
    %c0_7 = arith.constant 0 : index
    %c0_8 = arith.constant 0 : index
    %c0_9 = arith.constant 0 : index
    %17 = vector.load %arg3[%c0_7, %c0_8, %c0_9] : memref<1x4x256xf32, #tpu.memory_space<vmem>>, vector<1x4x256xf32>
    %18 = vector.shape_cast %17 : vector<1x4x256xf32> to vector<4x256xf32>
    %19 = vector.shape_cast %16 : vector<4x256xf32> to vector<1x4x256xf32>
    tpu.vector_store %arg3[%c0_7, %c0_8, %c0_9], %19 {strides = array<i32>} : memref<1x4x256xf32, #tpu.memory_space<vmem>>, vector<1x4x256xf32>,
    return
  }
  func.func @transform_0(%arg0: i32) -> (i32, i32) {
    %c0_i32 = arith.constant 0 : i32
    %c0_i32_0 = arith.constant 0 : i32
    %c0_i32_1 = arith.constant 0 : i32
    return %c0_i32, %c0_i32_0 : i32, i32
  }
  func.func @transform_1(%arg0: i32) -> (i32, i32, i32) {
    %c0_i32 = arith.constant 0 : i32
    %c0_i32_0 = arith.constant 0 : i32
    %c0_i32_1 = arith.constant 0 : i32
    return %arg0, %c0_i32, %c0_i32_0 : i32, i32, i32
  }
  func.func @transform_2(%arg0: i32) -> (i32, i32, i32) {
    %c0_i32 = arith.constant 0 : i32
    %c0_i32_0 = arith.constant 0 : i32
    %c0_i32_1 = arith.constant 0 : i32
    return %arg0, %c0_i32, %c0_i32_0 : i32, i32, i32
  }
}

</mosaic_0001>

<bundles_post_ra>
// kernel: tpu_custom_call.1
= control target key start
LH: loop header
LB: loop body
LE: loop exit
PB: predicated region body
PF: predicated region fallthrough
CT: control target
= control target key end

     0   :  { %s791_s0 = inlined_call_operand.<no memory space> [shape: f32[1,1], index: 0, kind: input, shape index: {}]   ;;  %s792_s1 = inlined_call_operand.hbm [shape: f32[2,4,256], index: 1, kind: input, shape index: {}]   ;;  %s793_s2 = inlined_call_operand.hbm [shape: f32[2,4,256], index: 2, kind: output, shape index: {}]  }
   0x1   :  { %v7_v0 = vstv %s791_s0 }
   0x2   :  { %8 = vst [vmem:[#allocation2] sm:$0x1] %v7_v0 }
   0x3   :  { %9 = vsyncpa [#allocation4], 0 }
   0x4   :  { %11 = vsyncpa [#allocation4 + $0x1], 0 }
   0x5   :  { %12 = vsyncpa [#allocation5], 0 }
   0x6   :  { %14 = vsyncpa [#allocation5 + $0x1], 0  ;;  %s626_s11 = smov 0   ;;  %s628_s12 = smov 0  }
   0x7   :  { %s630_s13 = smov 0   ;;  %s632_s14 = smov 0  }
   0x8 LB: > { %s647_s0 = sadd.s32 4294967295, %s602_s14   ;;  %s431_s15 = sadd.s32 4294967294, %s602_s14   ;;  %s602_s14 = sphi %s632_s14, %s808_s14   ;;  %s598_s13 = sphi %s630_s13, %s807_s13   ;;  %s594_s12 = sphi %s628_s12, %s806_s12   ;;  %s590_s11 = sphi %s626_s11, %s805_s11  }
   0x9   : > { %s651_s16 = sadd.s32 1, %s602_s14   ;;  %s48_s17 = sadd.s32 1, %s598_s13 }
   0xa   : > { %s45_s18 = ssub.s32 %s602_s14, %s651_s16  ;;  %p55_p0 = scmp.ne.s32.totalorder %s598_s13, %s594_s12 }
   0xb   : > { %p46_p1 = scmp.eq.s32.totalorder %s45_s18, 0  ;;  %p56_p2 = scmp.eq.s32.totalorder %s602_s14, 0 }
   0xc   : > { %p61_p3 = scmp.ne.s32.totalorder %s594_s12, %s590_s11  ;;  %p62_p4 = scmp.eq.s32.totalorder %s647_s0, 0 }
   0xd   : > { %s663_s19 = scalar_select %p46_p1, %s598_s13, %s48_s17  }
   0xe   : > { %p665_p5 = por %p56_p2, %p55_p0  ;;  %p669_p6 = por %p62_p4, %p61_p3 }
   0xf   : > { %p85_p7 = scmp.eq.s32.totalorder %s647_s0, 1  ;;  %p91_p8 = scmp.eq.s32.totalorder %s431_s15, 1 }
  0x10   : > { %p463_p10 = scmp.lt.s32.totalorder %s602_s14, 2  ;;  %s114_s24 = sand.u32 1, %s598_s13  }
  0x11   : > { %p676_p11 = por %p85_p7, %p55_p0  ;;  %p680_p12 = por %p91_p8, %p61_p3 }
  0x12   : > { %s449_s25 = sshll.u32 %s602_s14, 7  ;;  %s434_s26 = sshll.u32 %s114_s24, 3 }
  0x13   : > { %s797_s22 = scalar_select %p676_p11, 1, 0 }
  0x14   : > { %s798_s23 = scalar_select %p680_p12, 1, 0 }
  0x15   : > { %s689_s29 = scalar_lea.hbm %s792_s1, %s449_s25  ;;  %s118_s30 = scalar_lea.vmem [#allocation3], %s434_s26 }
  0x16   : > { %s126_s3 = sshll.u32 %s118_s30, 4  ;;  %p693_p13 = pnand %p463_p10, %p665_p5  ;;  %s697_s3 = int_to_ptr.vmem [resolvable:$true] %s126_s3 }
  0x17   : > { %s115_s5 = scalar_lea.sflag [#allocation4], %s114_s24  ;;  %s506_s6 = scalar_lea.hbm %s689_s29, 128 }
  0x18   : > { %p507_p2 = scmp.ne.s32.totalorder %s689_s29, %s506_s6  ;;  %p508_p3 = pneg %p693_p13 }
  0x19   : > { %s511_s9 = scalar_lea.hbm %s792_s1, 256  ;;  %p512_p5 = scmp.lt.u32.totalorder %s689_s29, %s792_s1 }
  0x1a   : > { %p509_p4 = pnand %p508_p3, %p507_p2  ;;  %p513_p8 = scmp.lt.u32.totalorder %s511_s9, %s506_s6 }
  0x1b   : > { %p515_p9 = scmp.lt.u32.totalorder %s506_s6, %s689_s29 }
  0x1c   : > { %p510_p7 = pneg %p509_p4  ;;  %p514_p10 = por %p513_p8, %p512_p5 }
  0x1e   : > { %p516_p0 = por %p515_p9, %p514_p10 }
  0x20   : > { %p517_p1 = pnand %p516_p0, %p510_p7 }
  0x22   : > { %520 = shalt.err (!%p517_p1)
}
  0x23   : > { %s521_s17 = scalar_lea.vmem %s697_s3, 128  ;;  %s604_s18 = smov [#allocation3]  }
  0x24   : > { %p522_p2 = scmp.ne.s32.totalorder %s697_s3, %s521_s17  ;;  %s526_s20 = sshll.u32 %s604_s18, 4  ;;  %s527_s20 = int_to_ptr.vmem [resolvable:$false] %s526_s20 }
  0x25   : > { %s528_s24 = scalar_lea.vmem %s527_s20, 256  ;;  %p529_p11 = scmp.lt.s32.totalorder %s697_s3, %s527_s20 }
  0x26   : > { %p524_p4 = pnand %p522_p2, %p508_p3  ;;  %p530_p5 = scmp.lt.s32.totalorder %s528_s24, %s521_s17 }
  0x28   : > { %p525_p12 = pneg %p524_p4  ;;  %p531_p8 = por %p530_p5, %p529_p11 }
  0x2a   : > { %p532_p9 = pnand %p531_p8, %p525_p12 }
  0x2c   : > { %535 = shalt.err (!%p532_p9)
}
  0x2d   : > { %458 = dma.hbm_to_vmem [thread:$0]  (!%p693_p13), %s689_s29, 128, %s697_s3, %s115_s5  }
  0x2e   : > { %p800_p0 = scmp.lt.s32.totalorder %s602_s14, 3  ;;  %p801_p1 = scmp.ge.s32.totalorder %s602_s14, 1 }
  0x30   : > { %p132_p3 = pnand %p801_p1, %p800_p0 }
  0x31   : > { %s731_s25 = sand.u32 (!%p132_p3), 1, %s594_s12  }
  0x32   : > { %135 = sbr.rel (%p132_p3) target bundleno = 952 (0x3b8), region = 28  ;;  %s438_s26 = sshll.u32 (!%p132_p3), %s731_s25, 3 }
  0x33   : > { %s138_s27 = scalar_lea.sflag (!%p132_p3), [#allocation4], %s731_s25  ;;  %s141_s28 = scalar_lea.vmem (!%p132_p3), [#allocation3], %s438_s26 }
  0x39   : > { %581 = dma.done.wait (%p669_p6), %s138_s27, 128  }
  0x3a   : > { %583 = vsyncadd (%p669_p6), %s138_s27, 4294967168  ;;  %v162_v1 = vld [vmem:[%s141_s28] sm:$0xff]  ;;  %vm236_vm0 = vcmask 27648   ;;  %v605_v11 = vmov 0   ;;  %v440_v13 = vld [vmem:[#allocation2] ss:$0 sm:$0xff] }
  0x3b   : > { %v164_v2 = vcombine.high %v162_v1, %v162_v1  ;;  %499 = vset.pattern.permute.xlu1 %v605_v11  ;;  %500 = vset.pattern.permute.xlu0 %v605_v11  ;;  %vm265_vm1 = vcmask 1043456   ;;  %v606_v16 = vmov 0.0   ;;  %vm261_vm2 = vcmask 31744   ;;  %s450_s21 = sshll.u32 %s647_s0, 7  ;;  %s161_s29 = scalar_lea.vmem [#allocation6], %s438_s26 }
  0x3c   : > { %334 = vmatprep.mubr.f32.mxu1 %v606_v16  ;;  %s361_s30 = sshll.u32 %s161_s29, 4  ;;  %s747_s5 = scalar_lea.hbm %s793_s2, %s450_s21  ;;  %s749_s30 = int_to_ptr.vmem [resolvable:$true] %s361_s30 }
  0x3d   : > { %166 = vmatprep.subr.mxu0 %v164_v2  ;;  %230 = vmatprep.mubr.f32.mxu0 %v164_v2  ;;  %s347_s6 = scalar_lea.sflag [#allocation5], %s731_s25  ;;  %s536_s7 = scalar_lea.vmem %s749_s30, 128 }
  0x3e   : > { %167 = vmatpush1.xpose.msra.mxu0 %v162_v1  ;;  %441 = vmatprep.subr.msk.mxu1 %vm265_vm1, %v164_v2  ;;  %p537_p6 = scmp.ne.s32.totalorder %s749_s30, %s536_s7  ;;  %p802_p11 = scmp.ne.s32.totalorder %s797_s22, 0 }
  0x3f   : > { %442 = vmatpush1.msk.msra.mxu1 %vm265_vm1, %v162_v1  ;;  %s607_s0 = smov [#allocation6]  }
  0x40   : > { %p538_p12 = pnand %p537_p6, %p802_p11  ;;  %s540_s8 = sshll.u32 %s607_s0, 4  ;;  %s541_s8 = int_to_ptr.vmem [resolvable:$false] %s540_s8 }
  0x41   : > { %231 = vmatmul.mubr.f32.vlgmr.msra.gmra.mrb[0].mxu0 %v162_v1  ;;  %s542_s9 = scalar_lea.vmem %s541_s8, 256  ;;  %p543_p7 = scmp.lt.s32.totalorder %s749_s30, %s541_s8 }
  0x42   : > { %p539_p13 = pneg %p538_p12  ;;  %p544_p10 = scmp.lt.s32.totalorder %s542_s9, %s536_s7 }
  0x44   : > { %p545_p2 = por %p544_p10, %p543_p7 }
  0x46   : > { %p546_p4 = pnand %p545_p2, %p539_p13 }
 0x114   : > { %v232_v3 = vpop.f32.mrb[0].mxu0 }
 0x115   : > { %v234_v4 = vpop.f32.mrb[1].mxu0  ;;  %v237_v5 = vsel %vm236_vm0, %v232_v3, inf }
 0x116   : > { %238 = vmin.xlane.f32.xlu0 %v237_v5 }
 0x1a3   : > { %v239_v6 = vpop.xlane.xlu0 %238 }
 0x1a4   : > { %v240_v7 = vsub.f32 %v239_v6, %v232_v3 }
 0x1a6   : > { %v241_v8 = vmul.f32 1.442695, %v240_v7 }
 0x1a8   : > { %502 = vpow2.f32 %v241_v8 }
 0x1b2   : > { %v503_v9 = vpop.eup %502 }
 0x1b3   : > { %v243_v10 = vsel %vm236_vm0, %v503_v9, 0.0 }
 0x1b4   : > { %244 = vadd.xlane.f32.xlu0 %v243_v10 }
 0x241   : > { %v245_v12 = vpop.xlane.xlu0 %244 }
 0x242   : > { %504 = vrcp.f32 %v245_v12 }
 0x24c   : > { %v505_v14 = vpop.eup %504 }
 0x24d   : > { %v254_v15 = vmul.f32 %v505_v14, %v440_v13 }
 0x24f   : > { %257 = vperm.xlu1 %499, %v254_v15  }
 0x2ce   : > { %v258_v17 = vpop.permute.xlu1 %257 }
 0x2cf   : > { %v260_v18 = vmul.f32 %v503_v9, %v258_v17 }
 0x2d1   : > { %443 = vmatmul.mubr.msk.f32.vlgmr.msra.gmra.mrb[0].mxu1 %vm261_vm2, %v260_v18 }
 0x3a4   : > { %v336_v19 = vpop.f32.mrb[0].mxu1 }
 0x3a5   : > { %v337_v20 = vadd.f32 %v336_v19, %v162_v1  ;;  %v338_v21 = vpop.f32.mrb[1].mxu1 }
 0x3a6   : > { %v339_v22 = vadd.f32 %v338_v21, %v164_v2 }
 0x3a8   : > { %v343_v23 = vcombine.low %v337_v20, %v339_v22 }
 0x3aa   : > { %345 = vst [vmem:[%s161_s29] sm:$0xff] %v343_v23 }
 0x3ab   : > { %549 = shalt.err (!%p546_p4)
}
 0x3ac   : > { %s550_s10 = scalar_lea.hbm %s747_s5, 128  ;;  %s554_s18 = scalar_lea.hbm %s793_s2, 256 }
 0x3ad   : > { %p551_p5 = scmp.ne.s32.totalorder %s747_s5, %s550_s10  ;;  %p555_p0 = scmp.lt.u32.totalorder %s747_s5, %s793_s2 }
 0x3ae   : > { %p556_p1 = scmp.lt.u32.totalorder %s554_s18, %s550_s10  ;;  %p558_p6 = scmp.lt.u32.totalorder %s550_s10, %s747_s5 }
 0x3af   : > { %p552_p8 = pnand %p551_p5, %p802_p11 }
 0x3b0   : > { %p557_p3 = por %p556_p1, %p555_p0 }
 0x3b1   : > { %p553_p9 = pneg %p552_p8 }
 0x3b2   : > { %p559_p12 = por %p558_p6, %p557_p3 }
 0x3b4   : > { %p560_p13 = pnand %p559_p12, %p553_p9 }
 0x3b6   : > { %563 = shalt.err (!%p560_p13)
}
 0x3b7   : > { %453 = dma.vmem_to_hbm [thread:$0]  (%p802_p11), %s749_s30, 128, %s747_s5, %s347_s6  }
 0x3b8 PF: > { %s373_s25 = sand.u32 1, %s590_s11   ;;  %p803_p7 = scmp.ne.s32.totalorder %s798_s23, 0 }
 0x3b9   : > { %p804_p10 = scmp.ge.s32.totalorder %s602_s14, 2  ;;  %s374_s26 = scalar_lea.sflag [#allocation5], %s373_s25 }
 0x3bb   : > { %p460_p2 = pnand %p804_p10, %p803_p7 }
 0x3bd   : > { %585 = dma.done.wait (!%p460_p2), %s374_s26, 128  }
 0x3be   : > { %587 = vsyncadd (!%p460_p2), %s374_s26, 4294967168  ;;  %p17_p4 = scmp.ge.s32.totalorder %s651_s16, 4   ;;  %s805_s11 = smov %s594_s12 }
 0x3bf   : > { %s806_s12 = smov %s598_s13  ;;  %s807_s13 = smov %s663_s19 }
 0x3c0   : > { %s808_s14 = smov %s651_s16  ;;  %19 = sbr.rel (!%p17_p4) target bundleno = 8 (0x8), region = 73 }
 0x3c7   :  { %379 = vsyncpa [#allocation4], 1 }
 0x3c8   :  { %381 = vsyncpa [#allocation4 + $0x1], 1 }
 0x3c9   :  { %382 = vsyncpa [#allocation5], 1 }
 0x3ca   :  { %384 = vsyncpa [#allocation5 + $0x1], 1 }

</bundles_post_ra>
